<compile_context>
chip_gen: v6e
topology: v6e:2x2x1
jax: 0.10.0
libtpu: 0.0.40
codegen_flags: <defaults>
</compile_context>

<pallas_src>
import math
import functools

import jax
import jax.numpy as jnp
from jax import lax
from jax.experimental import pallas as pl
from jax.experimental.pallas import tpu as pltpu


def _round_up(v, m):
    return ((v + m - 1) // m) * m


def _cosnorm_kernel(x_ref, w_ref, winv_ref, o_ref, *, scale):
    x = x_ref[...]          # (TM, K)  input dtype
    w = w_ref[...]          # (TN, K)  input dtype

    # Raw logits: contract the shared last (lane) dim on the MXU, f32 accum.
    s = lax.dot_general(
        x, w,
        dimension_numbers=(((1,), (1,)), ((), ())),
        preferred_element_type=jnp.float32,
    )                        # (TM, TN) f32

    # Row sum-of-squares of the input tile in f32 (tiny (TM, 1) result).
    xf = x.astype(jnp.float32)
    sumsq_x = jnp.sum(xf * xf, axis=1, keepdims=True)      # (TM, 1)

    # Fold normalization + scale into output scaling:
    #   out_ij = (scale / ||x_i||) * s_ij * (1 / ||w_j||)
    # rsqrt goes to the EUP (its own VLIW slot).  Zero-norm rows yield
    # inf/NaN, matching the divide-by-zero behavior of the PyTorch module;
    # padded rows/cols are sliced away by the wrapper.
    row_scale = scale * lax.rsqrt(sumsq_x)                  # (TM, 1)
    col_scale = winv_ref[...]                               # (1, TN) f32

    o_ref[...] = (s * row_scale * col_scale).astype(o_ref.dtype)


def cosnorm_classifier(x, weight, scale=32, block_m=256, block_n=256):
    """x: (B, in_dims), weight: (out_dims, in_dims) -> (B, out_dims)."""
    B, K = x.shape
    N, Kw = weight.shape
    assert K == Kw, "feature dims of x and weight must match"

    weight = weight.astype(x.dtype)

    # Per-class inverse L2 norms, computed once in f32 (before any padding so
    # padded classes get a clean 0 scale instead of inf).
    wf = weight.astype(jnp.float32)
    w_inv_norm = (1.0 / jnp.sqrt(jnp.sum(wf * wf, axis=1)))[None, :]   # (1, N)

    # Tile sizes: lane-dense (multiple-of-128) class tiles, multiple-of-8
    # batch tiles, clamped for small problems.
    tm = min(block_m, _round_up(B, 8))
    tn = min(block_n, _round_up(N, 128))
    b_pad = _round_up(B, tm)
    n_pad = _round_up(N, tn)
    k_pad = _round_up(K, 128)

    # Zero padding changes neither the norms nor the dot products of real rows.
    if (b_pad, k_pad) != (B, K):
        x = jnp.pad(x, ((0, b_pad - B), (0, k_pad - K)))
    if (n_pad, k_pad) != (N, K):
        weight = jnp.pad(weight, ((0, n_pad - N), (0, k_pad - K)))
    if n_pad != N:
        w_inv_norm = jnp.pad(w_inv_norm, ((0, 0), (0, n_pad - N)))

    # NOTE: for very wide in_dims this keeps the whole (padded) feature dim in
    # each block; if that ever exceeds VMEM, add a trailing "arbitrary" K grid
    # axis with an f32 accumulator + partial-sumsq scratch (P3 pattern).

    kernel = functools.partial(_cosnorm_kernel, scale=float(scale))
    out = pl.pallas_call(
        kernel,
        out_shape=jax.ShapeDtypeStruct((b_pad, n_pad), x.dtype),
        grid_spec=pltpu.PrefetchScalarGridSpec(
            num_scalar_prefetch=0,
            grid=(b_pad // tm, n_pad // tn),
            in_specs=[
                pl.BlockSpec((tm, k_pad), lambda i, j: (i, 0)),   # x tile
                pl.BlockSpec((tn, k_pad), lambda i, j: (j, 0)),   # w tile
                pl.BlockSpec((1, tn), lambda i, j: (0, j)),       # 1/||w_j||
            ],
            out_specs=pl.BlockSpec((tm, tn), lambda i, j: (i, j)),
        ),
        compiler_params=pltpu.CompilerParams(
            dimension_semantics=("parallel", "parallel"),
            vmem_limit_bytes=32 * 1024 * 1024,
        ),
    )(x, weight, w_inv_norm)

    return out[:B, :N]


def cosnorm_reference(x, weight, scale=32):
    # Literal PyTorch formula, matmul at HIGHEST precision for an accurate ref.
    norm_x = jnp.linalg.norm(x, axis=1, keepdims=True)
    ex = x / norm_x
    ew = weight / jnp.linalg.norm(weight, axis=1, keepdims=True)
    return jnp.dot(ex * scale, ew.T, precision=jax.lax.Precision.HIGHEST)


def _bf16_grid(a):
    # Snap test inputs to the bf16 grid so the kernel's raw-operand MXU matmul
    # is exact regardless of the backend's default f32 matmul precision; the
    # reference is computed at HIGHEST precision.
    return a.astype(jnp.bfloat16).astype(jnp.float32)


if __name__ == "__main__":
    key = jax.random.PRNGKey(0)

    # Case 1: shapes consistent with the module defaults (in=32, out=8, B=4).
    B, in_dims, out_dims, scale = 4, 32, 8, 32
    kx, kw, key = jax.random.split(key, 3)
    stdv = 1.0 / math.sqrt(in_dims)
    weight = _bf16_grid(
        jax.random.uniform(kw, (out_dims, in_dims), jnp.float32, -stdv, stdv))
    x = _bf16_grid(jax.random.normal(kx, (B, in_dims), jnp.float32))

    out = jax.block_until_ready(cosnorm_classifier(x, weight, scale=scale))
    ref = cosnorm_reference(x, weight, scale=scale)
    assert out.shape == (B, out_dims)
    # 1e-3 tolerance covers MXU accumulation order + EUP rsqrt vs sqrt+div.
    assert jnp.allclose(out, ref, atol=1e-3, rtol=1e-3)

    # Case 2: non-aligned shapes exercising padding and a multi-step grid.
    B2, in2, out2 = 300, 200, 130
    kx2, kw2 = jax.random.split(key)
    stdv2 = 1.0 / math.sqrt(in2)
    w2 = _bf16_grid(
        jax.random.uniform(kw2, (out2, in2), jnp.float32, -stdv2, stdv2))
    x2 = _bf16_grid(jax.random.normal(kx2, (B2, in2), jnp.float32))

    out2_arr = jax.block_until_ready(cosnorm_classifier(x2, w2, scale=16))
    ref2 = cosnorm_reference(x2, w2, scale=16)
    assert out2_arr.shape == (B2, out2)
    assert jnp.allclose(out2_arr, ref2, atol=1e-3, rtol=1e-3)

    print("KERNEL_OK")
</pallas_src>

<mosaic_0001>
module attributes {stable_mosaic.version = 11 : i64} {
  func.func @_cosnorm_kernel(%arg0: i32, %arg1: i32, %arg2: memref<8x128xf32, #tpu.memory_space<vmem>>, %arg3: memref<128x128xf32, #tpu.memory_space<vmem>>, %arg4: memref<1x128xf32, #tpu.memory_space<vmem>>, %arg5: memref<8x128xf32, #tpu.memory_space<vmem>>) attributes {dimension_semantics = [#tpu.dimension_semantics<parallel>, #tpu.dimension_semantics<parallel>], iteration_bounds = array<i64: 1, 1>, scalar_prefetch = 0 : i64, scratch_operands = 0 : i64, tpu.core_type = #tpu.core_type<tc>, window_params = [{transform_indices = @transform_0, window_bounds = array<i64: 8, 128>}, {transform_indices = @transform_1, window_bounds = array<i64: 128, 128>}, {transform_indices = @transform_2, window_bounds = array<i64: 1, 128>}, {transform_indices = @transform_3, window_bounds = array<i64: 8, 128>}]} {
    %c0 = arith.constant 0 : index
    %c0_0 = arith.constant 0 : index
    %0 = vector.load %arg2[%c0, %c0_0] : memref<8x128xf32, #tpu.memory_space<vmem>>, vector<8x128xf32>
    %c0_1 = arith.constant 0 : index
    %c0_2 = arith.constant 0 : index
    %1 = vector.load %arg3[%c0_1, %c0_2] : memref<128x128xf32, #tpu.memory_space<vmem>>, vector<128x128xf32>
    %cst = arith.constant dense<0.000000e+00> : vector<8x128xf32>
    %2 = tpu.matmul %0, %1, %cst {dimension_numbers = #tpu.dot_dimension_numbers<[1], [1], [0], [0], [0, 0, 1, 0], [], []>} : vector<8x128xf32>, vector<128x128xf32>, vector<8x128xf32> -> vector<8x128xf32>
    %3 = arith.mulf %0, %0 : vector<8x128xf32>
    %cst_3 = arith.constant dense<0.000000e+00> : vector<8xf32>
    %4 = vector.multi_reduction <add>, %3, %cst_3 [1] : vector<8x128xf32> to vector<8xf32>
    %5 = vector.shape_cast %4 : vector<8xf32> to vector<8x1xf32>
    %6 = math.rsqrt %5 : vector<8x1xf32>
    %cst_4 = arith.constant 3.200000e+01 : f32
    %7 = vector.broadcast %cst_4 : f32 to vector<8x1xf32>
    %8 = arith.mulf %7, %6 : vector<8x1xf32>
    %c0_5 = arith.constant 0 : index
    %c0_6 = arith.constant 0 : index
    %9 = vector.load %arg4[%c0_5, %c0_6] : memref<1x128xf32, #tpu.memory_space<vmem>>, vector<1x128xf32>
    %10 = vector.broadcast %8 : vector<8x1xf32> to vector<8x128xf32>
    %11 = arith.mulf %2, %10 : vector<8x128xf32>
    %12 = vector.broadcast %9 : vector<1x128xf32> to vector<8x128xf32>
    %13 = arith.mulf %11, %12 : vector<8x128xf32>
    %c0_7 = arith.constant 0 : index
    %c0_8 = arith.constant 0 : index
    %14 = vector.load %arg5[%c0_7, %c0_8] : memref<8x128xf32, #tpu.memory_space<vmem>>, vector<8x128xf32>
    tpu.vector_store %arg5[%c0_7, %c0_8], %13 {strides = array<i32>} : memref<8x128xf32, #tpu.memory_space<vmem>>, vector<8x128xf32>,
    return
  }
  func.func @transform_0(%arg0: i32, %arg1: i32) -> (i32, i32) {
    %c0_i32 = arith.constant 0 : i32
    %c0_i32_0 = arith.constant 0 : i32
    return %arg0, %c0_i32 : i32, i32
  }
  func.func @transform_1(%arg0: i32, %arg1: i32) -> (i32, i32) {
    %c0_i32 = arith.constant 0 : i32
    %c0_i32_0 = arith.constant 0 : i32
    return %arg1, %c0_i32 : i32, i32
  }
  func.func @transform_2(%arg0: i32, %arg1: i32) -> (i32, i32) {
    %c0_i32 = arith.constant 0 : i32
    %c0_i32_0 = arith.constant 0 : i32
    return %c0_i32, %arg1 : i32, i32
  }
  func.func @transform_3(%arg0: i32, %arg1: i32) -> (i32, i32) {
    %c0_i32 = arith.constant 0 : i32
    return %arg0, %arg1 : i32, i32
  }
}

</mosaic_0001>

<bundles_post_ra>
// kernel: tpu_custom_call.1
= control target key start
LH: loop header
LB: loop body
LE: loop exit
PB: predicated region body
PF: predicated region fallthrough
CT: control target
= control target key end

     0   :  { %8 = vsyncpa [#allocation3], 0  ;;  %s326_s0 = inlined_call_operand.hbm [shape: f32[8,128], index: 0, kind: input, shape index: {}]   ;;  %s327_s1 = inlined_call_operand.hbm [shape: f32[128,128], index: 1, kind: input, shape index: {}]   ;;  %s328_s2 = inlined_call_operand.vmem [shape: f32[1,128], index: 2, kind: input, shape index: {}]   ;;  %s329_s3 = inlined_call_operand.hbm [shape: f32[8,128], index: 3, kind: output, shape index: {}]  }
   0x1   :  { %9 = vsyncpa [#allocation6], 0 }
   0x2   :  { %10 = vsyncpa [#allocation4], 0  ;;  %s287_s12 = smov [#allocation2]   ;;  %s288_s14 = smov [#allocation5]  }
   0x3   :  { %s17_s13 = sshll.u32 %s287_s12, 4  ;;  %s26_s15 = sshll.u32 %s288_s14, 4  ;;  %s18_s13 = int_to_ptr.vmem [resolvable:$true] %s17_s13  ;;  %s27_s15 = int_to_ptr.vmem [resolvable:$true] %s26_s15 }
   0x4   :  { %s229_s16 = scalar_lea.vmem %s18_s13, 128  ;;  %p234_p1 = scmp.lt.s32.totalorder %s18_s13, %s18_s13 }
   0x5   :  { %p230_p0 = scmp.ne.s32.totalorder %s18_s13, %s229_s16  ;;  %p235_p2 = scmp.lt.s32.totalorder %s229_s16, %s229_s16 }
   0x7   :  { %p236_p3 = por %p235_p2, %p234_p1 }
   0x9   :  { %p237_p4 = pnand %p236_p3, %p230_p0 }
   0xb   :  { %240 = shalt.err (!%p237_p4)
}
   0xc   :  { %20 = dma.hbm_to_vmem [thread:$0]  %s326_s0, 128, %s18_s13, [#allocation3]  }
   0xd   :  { %s249_s19 = scalar_lea.vmem %s27_s15, 2048  ;;  %p254_p6 = scmp.lt.s32.totalorder %s27_s15, %s27_s15 }
   0xe   :  { %p250_p5 = scmp.ne.s32.totalorder %s27_s15, %s249_s19  ;;  %p255_p7 = scmp.lt.s32.totalorder %s249_s19, %s249_s19 }
  0x10   :  { %p256_p8 = por %p255_p7, %p254_p6 }
  0x12   :  { %p257_p9 = pnand %p256_p8, %p250_p5 }
  0x14   :  { %260 = shalt.err (!%p257_p9)
}
  0x15   :  { %s289_s20 = smov 128   ;;  %s290_s21 = smov 8  }
  0x16   :  { %32 = dma.hbm_to_vmem [thread:$0]  %s327_s1, 2048, %s27_s15, [#allocation6], %s289_s20, %s289_s20, %s290_s21  }
  0x17   :  { %281 = dma.done.wait [#allocation3], 128  }
  0x18   :  { %282 = vsyncadd [#allocation3], 4294967168 }
  0x19   :  { %283 = dma.done.wait [#allocation6], 2048  }
  0x1a   :  { %284 = vsyncadd [#allocation6], 4294965248  ;;  %v291_v0 = vmov 0.0   ;;  %vm292_vm0 = vmmov 0   ;;  %v57_v1 = vld [vmem:[#allocation5 + $0x78] sm:$0xff]  ;;  %v56_v2 = vld [vmem:[#allocation5 + $0x70] sm:$0xff] }
  0x1b   :  { %177 = vmatprep.subr.mxu0 %v291_v0  ;;  %209 = vmatprep.mubr.msk.f32.mxu0 %vm292_vm0, %v291_v0  ;;  %v41_v3 = vld [vmem:[#allocation2] sm:$0xff]  ;;  %v55_v4 = vld [vmem:[#allocation5 + $0x68] sm:$0xff]  ;;  %v54_v6 = vld [vmem:[#allocation5 + $0x60] sm:$0xff]  ;;  %s293_s24 = smov [#allocation7]  }
  0x1c   :  { %178 = vmatpush3.xpose.msra.mxu0 %v57_v1  ;;  %v128_v5 = vmul.f32 %v41_v3, %v41_v3  ;;  %v53_v7 = vld [vmem:[#allocation5 + $0x58] sm:$0xff]  ;;  %v52_v8 = vld [vmem:[#allocation5 + $0x50] sm:$0xff]  ;;  %v51_v9 = vld [vmem:[#allocation5 + $0x48] sm:$0xff]  ;;  %s149_s25 = sshll.u32 %s293_s24, 4  ;;  %s150_s25 = int_to_ptr.vmem [resolvable:$true] %s149_s25 }
  0x1d   :  { %179 = vmatprep.subr.mxu0 %v291_v0  ;;  %v50_v10 = vld [vmem:[#allocation5 + $0x40] sm:$0xff]  ;;  %v49_v11 = vld [vmem:[#allocation5 + $0x38] sm:$0xff]  ;;  %v48_v12 = vld [vmem:[#allocation5 + $0x30] sm:$0xff]  ;;  %s261_s26 = scalar_lea.vmem %s150_s25, 128  ;;  %p266_p11 = scmp.lt.s32.totalorder %s150_s25, %s150_s25 }
  0x1e   :  { %129 = vadd.xlane.f32.xlu0 %v128_v5  ;;  %v47_v13 = vld [vmem:[#allocation5 + $0x28] sm:$0xff]  ;;  %v46_v14 = vld [vmem:[#allocation5 + $0x20] sm:$0xff]  ;;  %v45_v15 = vld [vmem:[#allocation5 + $0x18] sm:$0xff]  ;;  %p262_p10 = scmp.ne.s32.totalorder %s150_s25, %s261_s26  ;;  %p267_p12 = scmp.lt.s32.totalorder %s261_s26, %s261_s26 }
  0x1f   :  { %v44_v16 = vld [vmem:[#allocation5 + $0x10] sm:$0xff]  ;;  %v43_v17 = vld [vmem:[#allocation5 + $0x8] sm:$0xff]  ;;  %v42_v18 = vld [vmem:[#allocation5] sm:$0xff] }
  0x20   :  { %180 = vmatpush3.xpose.msra.mxu0 %v56_v2  ;;  %v159_v23 = vld [vmem:[%s328_s2] ss:$0 sm:$0xff]  ;;  %p268_p13 = por %p267_p12, %p266_p11 }
  0x21   :  { %181 = vmatprep.subr.mxu0 %v291_v0 }
  0x22   :  { %p269_p0 = pnand %p268_p13, %p262_p10 }
  0x24   :  { %182 = vmatpush3.xpose.msra.mxu0 %v55_v4 }
  0x25   :  { %183 = vmatprep.subr.mxu0 %v291_v0 }
  0x28   :  { %184 = vmatpush3.xpose.msra.mxu0 %v54_v6 }
  0x29   :  { %185 = vmatprep.subr.mxu0 %v291_v0 }
  0x2c   :  { %186 = vmatpush3.xpose.msra.mxu0 %v53_v7 }
  0x2d   :  { %187 = vmatprep.subr.mxu0 %v291_v0 }
  0x30   :  { %188 = vmatpush3.xpose.msra.mxu0 %v52_v8 }
  0x31   :  { %189 = vmatprep.subr.mxu0 %v291_v0 }
  0x34   :  { %190 = vmatpush3.xpose.msra.mxu0 %v51_v9 }
  0x35   :  { %191 = vmatprep.subr.mxu0 %v291_v0 }
  0x38   :  { %192 = vmatpush3.xpose.msra.mxu0 %v50_v10 }
  0x39   :  { %193 = vmatprep.subr.mxu0 %v291_v0 }
  0x3c   :  { %194 = vmatpush3.xpose.msra.mxu0 %v49_v11 }
  0x3d   :  { %195 = vmatprep.subr.mxu0 %v291_v0 }
  0x40   :  { %196 = vmatpush3.xpose.msra.mxu0 %v48_v12 }
  0x41   :  { %197 = vmatprep.subr.mxu0 %v291_v0 }
  0x44   :  { %198 = vmatpush3.xpose.msra.mxu0 %v47_v13 }
  0x45   :  { %199 = vmatprep.subr.mxu0 %v291_v0 }
  0x48   :  { %200 = vmatpush3.xpose.msra.mxu0 %v46_v14 }
  0x49   :  { %201 = vmatprep.subr.mxu0 %v291_v0 }
  0x4c   :  { %202 = vmatpush3.xpose.msra.mxu0 %v45_v15 }
  0x4d   :  { %203 = vmatprep.subr.mxu0 %v291_v0 }
  0x50   :  { %204 = vmatpush3.xpose.msra.mxu0 %v44_v16 }
  0x51   :  { %205 = vmatprep.subr.mxu0 %v291_v0 }
  0x54   :  { %206 = vmatpush3.xpose.msra.mxu0 %v43_v17 }
  0x55   :  { %207 = vmatprep.subr.mxu0 %v291_v0 }
  0x58   :  { %208 = vmatpush3.xpose.msra.mxu0 %v42_v18 }
  0x5b   :  { %210 = vmatmul.mubr.f32.vlgmr.msra.gmra.mxu0 %v41_v3 }
  0xa7   :  { %v130_v19 = vpop.xlane.xlu0 %129 }
  0xa8   :  { %219 = vrsqrt.f32 %v130_v19 }
  0xb5   :  { %v220_v20 = vpop.eup %219 }
  0xb6   :  { %v132_v21 = vmul.f32 32.0, %v220_v20 }
 0x11b   :  { %v124_v22 = vpop.f32.mrf.mxu0 }
 0x11c   :  { %v134_v24 = vmul.f32 %v132_v21, %v124_v22 }
 0x11d   :  { %v211_v25 = vpop.f32.mrf.mxu0 }
 0x11e   :  { %v141_v26 = vmul.f32 %v159_v23, %v134_v24 }
 0x120   :  { %142 = vst [vmem:[#allocation7] sm:$0xff] %v141_v26 }
 0x121   :  { %272 = shalt.err (!%p269_p0)
}
 0x122   :  { %152 = dma.vmem_to_hbm [thread:$0]  %s150_s25, 128, %s329_s3, [#allocation4]  }
 0x123   :  { %285 = dma.done.wait [#allocation4], 128  }
 0x124   :  { %286 = vsyncadd [#allocation4], 4294967168 }
 0x125   :  { %156 = vsyncpa [#allocation3], 1 }
 0x126   :  { %157 = vsyncpa [#allocation6], 1 }
 0x127   :  { %158 = vsyncpa [#allocation4], 1 }

</bundles_post_ra>
